<compile_context>
chip_gen: v6e
topology: v6e:2x2x1
jax: 0.10.0
libtpu: 0.0.40
codegen_flags: <defaults>
</compile_context>

<pallas_src>
import functools

import jax
import jax.numpy as jnp
import numpy as np
from jax.experimental import pallas as pl
from jax.experimental.pallas import tpu as pltpu


def _elbo_partial_kernel(x_ref, t_ref, out_ref, *, k):
    """One grid step: partial sum of input[i, target[i]] over this tile.

    x_ref : (TILE, L) log-probabilities (native dtype), L = k * C lanes.
    t_ref : (TILE, k) int32 flat target lane indices (j*C + target), -1 padding.
    out_ref : (1, 1) f32 partial sum in SMEM (one block per grid step).
    """
    x = x_ref[...].astype(jnp.float32)                          # (TILE, L)
    col = jax.lax.broadcasted_iota(jnp.int32, x.shape, 1)       # lane iota
    t = t_ref[...]                                              # (TILE, k)
    mask = col == t[:, 0:1]
    for j in range(1, k):                                       # static unroll
        mask = mask | (col == t[:, j:j + 1])
    # Sentinel -1 targets (grid padding / ragged OOB rows) never match col>=0.
    out_ref[0, 0] = jnp.sum(jnp.where(mask, x, jnp.float32(0.0)))


def _round_up(x, m):
    return (x + m - 1) // m * m


def _scoped_vmem_limit():
    """Per-generation scoped-VMEM budget: ~64 MiB on v5e/v6e, ~45 MiB on v7x."""
    try:
        phys = pltpu.get_tpu_info().vmem_capacity_bytes
    except Exception:
        phys = 64 << 20  # assume the smallest (v7x per-TC) if query fails
    return min(64 << 20, int(phys * 0.70))


def _pick_tile_rows(np_rows, lanes_pad, itemsize, scoped_limit, align):
    """Physical rows per grid step, sized against the scoped VMEM budget."""
    # Double-buffered input + double-buffered (lane-padded) target block.
    per_row = 2 * lanes_pad * itemsize + 2 * 128 * 4
    budget = max(scoped_limit - (4 << 20), 4 << 20)   # headroom for overheads
    tile = budget // max(per_row, 1)
    tile = max(align, (tile // align) * align)
    if tile >= np_rows:
        return np_rows                                # single full-dim block
    # Keep >= ~4 grid steps on large inputs so DMA/compute actually overlap.
    total_in_bytes = np_rows * lanes_pad * itemsize
    if total_in_bytes > (8 << 20):
        cap = _round_up(pl.cdiv(np_rows, 4), align)
        tile = min(tile, max(align, cap))
    return tile


def elbo_forward(input_logprobs, target, kl, beta, train_size, tile_rows=None):
    """Pallas implementation of ELBO.forward."""
    n, c = input_logprobs.shape
    itemsize = jnp.dtype(input_logprobs.dtype).itemsize

    # Lane-dense packing for small class counts (free contiguous reshape).
    if c < 128 and 128 % c == 0 and n % (128 // c) == 0:
        k = 128 // c
    else:
        k = 1
    np_rows = n // k
    lanes = k * c
    x = input_logprobs.reshape(np_rows, lanes)

    # Flat per-sub-row target lane index: j*C + target for sub-row j.
    tgt = target.astype(jnp.int32)
    if k > 1:
        flat_t = (jnp.arange(n, dtype=jnp.int32) % k) * c + tgt
    else:
        flat_t = tgt
    flat_t = flat_t.reshape(np_rows, k)

    scoped_limit = _scoped_vmem_limit()
    lanes_pad = _round_up(lanes, 128)
    align = max(8, 32 // itemsize)          # 8 for f32, 16 for bf16 sublanes
    if tile_rows is None:
        tile_rows = _pick_tile_rows(np_rows, lanes_pad, itemsize,
                                    scoped_limit, align)
    num_tiles = pl.cdiv(np_rows, tile_rows)

    # Pad targets (only) with a -1 sentinel so ragged / OOB input rows are
    # masked without any per-tile row mask.  The input itself stays unpadded.
    pad = num_tiles * tile_rows - np_rows
    if pad:
        flat_t = jnp.concatenate(
            [flat_t, jnp.full((pad, k), -1, dtype=jnp.int32)], axis=0)

    kernel = functools.partial(_elbo_partial_kernel, k=k)

    partials = pl.pallas_call(
        kernel,
        out_shape=jax.ShapeDtypeStruct((num_tiles, 1), jnp.float32),
        grid=(num_tiles,),
        in_specs=[
            pl.BlockSpec((tile_rows, lanes), lambda i: (i, 0)),   # log-probs
            pl.BlockSpec((tile_rows, k), lambda i: (i, 0)),       # flat targets
        ],
        out_specs=pl.BlockSpec((1, 1), lambda i: (i, 0),
                               memory_space=pltpu.MemorySpace.SMEM),
        compiler_params=pltpu.CompilerParams(
            # Independent per-step partials -> parallel axis (2 TCs on v7x).
            dimension_semantics=("parallel",),
            vmem_limit_bytes=int(scoped_limit),
        ),
    )(x, flat_t)

    neg_scale = -float(train_size) / float(n)
    return (jnp.sum(partials) * jnp.float32(neg_scale)
            + jnp.asarray(beta, jnp.float32) * jnp.asarray(kl, jnp.float32))


def elbo_reference(input_logprobs, target, kl, beta, train_size):
    """Pure-JAX reference matching F.nll_loss(reduction='mean')."""
    picked = jnp.take_along_axis(
        input_logprobs.astype(jnp.float32),
        target[:, None].astype(jnp.int32), axis=1)
    nll = -jnp.mean(picked)
    return nll * train_size + beta * kl


if __name__ == "__main__":
    key = jax.random.PRNGKey(0)
    k1, k2, k3, k4, k5, k6, k7 = jax.random.split(key, 7)

    TRAIN_SIZE = 1000.0  # ELBO(train_size=1000)
    kl = jax.random.uniform(k3, (), dtype=jnp.float32) * 10.0
    beta = jnp.float32(0.1)

    # Case 1: small batch, C=32 -> lane-packed (k=4), single full-dim tile.
    N1, C1 = 8, 32
    logp1 = jax.nn.log_softmax(
        jax.random.normal(k1, (N1, C1), dtype=jnp.float32), axis=-1)
    tgt1 = jax.random.randint(k2, (N1,), 0, C1, dtype=jnp.int32)
    out1 = jax.block_until_ready(elbo_forward(logp1, tgt1, kl, beta, TRAIN_SIZE))
    ref1 = elbo_reference(logp1, tgt1, kl, beta, TRAIN_SIZE)
    np.testing.assert_allclose(np.asarray(out1), np.asarray(ref1),
                               rtol=1e-5, atol=1e-3)

    # Case 2: lane-packed + forced small tile -> multi-step grid with ragged
    # last tile, exercising the sentinel-target padding path.
    N2, C2 = 40, 32
    logp2 = jax.nn.log_softmax(
        jax.random.normal(k4, (N2, C2), dtype=jnp.float32), axis=-1)
    tgt2 = jax.random.randint(k5, (N2,), 0, C2, dtype=jnp.int32)
    out2 = jax.block_until_ready(
        elbo_forward(logp2, tgt2, kl, beta, TRAIN_SIZE, tile_rows=8))
    ref2 = elbo_reference(logp2, tgt2, kl, beta, TRAIN_SIZE)
    np.testing.assert_allclose(np.asarray(out2), np.asarray(ref2),
                               rtol=1e-5, atol=1e-3)

    # Case 3: unpacked path (C not a divisor of 128), bf16 input, single tile.
    N3, C3 = 12, 100
    logp3 = jax.nn.log_softmax(
        jax.random.normal(k6, (N3, C3), dtype=jnp.float32), axis=-1
    ).astype(jnp.bfloat16)
    tgt3 = jax.random.randint(k7, (N3,), 0, C3, dtype=jnp.int32)
    out3 = jax.block_until_ready(elbo_forward(logp3, tgt3, kl, beta, TRAIN_SIZE))
    ref3 = elbo_reference(logp3, tgt3, kl, beta, TRAIN_SIZE)
    np.testing.assert_allclose(np.asarray(out3), np.asarray(ref3),
                               rtol=1e-5, atol=1e-2)

    print("KERNEL_OK")
</pallas_src>

<mosaic_0001>
module attributes {stable_mosaic.version = 11 : i64} {
  func.func @_elbo_partial_kernel(%arg0: i32, %arg1: memref<2x128xf32, #tpu.memory_space<vmem>>, %arg2: memref<2x4xi32, #tpu.memory_space<vmem>>, %arg3: memref<1x1xf32, #tpu.memory_space<smem>>) attributes {dimension_semantics = [#tpu.dimension_semantics<parallel>], iteration_bounds = array<i64: 1>, scalar_prefetch = 0 : i64, scratch_operands = 0 : i64, tpu.core_type = #tpu.core_type<tc>, window_params = [{transform_indices = @transform_0, window_bounds = array<i64: 2, 128>}, {transform_indices = @transform_1, window_bounds = array<i64: 2, 4>}, {transform_indices = @transform_2, window_bounds = array<i64: 1, 1>}]} {
    %c0 = arith.constant 0 : index
    %c0_0 = arith.constant 0 : index
    %0 = vector.load %arg1[%c0, %c0_0] : memref<2x128xf32, #tpu.memory_space<vmem>>, vector<2x128xf32>
    %1 = tpu.iota {dimensions = array<i32: 1>} : vector<2x128xi32>
    %c0_1 = arith.constant 0 : index
    %c0_2 = arith.constant 0 : index
    %2 = vector.load %arg2[%c0_1, %c0_2] : memref<2x4xi32, #tpu.memory_space<vmem>>, vector<2x4xi32>
    %3 = vector.extract_strided_slice %2 {offsets = [0, 0], sizes = [2, 1], strides = [1, 1]} : vector<2x4xi32> to vector<2x1xi32>
    %4 = vector.broadcast %3 : vector<2x1xi32> to vector<2x128xi32>
    %5 = arith.cmpi eq, %1, %4 : vector<2x128xi32>
    %6 = vector.extract_strided_slice %2 {offsets = [0, 1], sizes = [2, 1], strides = [1, 1]} : vector<2x4xi32> to vector<2x1xi32>
    %7 = vector.broadcast %6 : vector<2x1xi32> to vector<2x128xi32>
    %8 = arith.cmpi eq, %1, %7 : vector<2x128xi32>
    %9 = arith.ori %5, %8 : vector<2x128xi1>
    %10 = vector.extract_strided_slice %2 {offsets = [0, 2], sizes = [2, 1], strides = [1, 1]} : vector<2x4xi32> to vector<2x1xi32>
    %11 = vector.broadcast %10 : vector<2x1xi32> to vector<2x128xi32>
    %12 = arith.cmpi eq, %1, %11 : vector<2x128xi32>
    %13 = arith.ori %9, %12 : vector<2x128xi1>
    %14 = vector.extract_strided_slice %2 {offsets = [0, 3], sizes = [2, 1], strides = [1, 1]} : vector<2x4xi32> to vector<2x1xi32>
    %15 = vector.broadcast %14 : vector<2x1xi32> to vector<2x128xi32>
    %16 = arith.cmpi eq, %1, %15 : vector<2x128xi32>
    %17 = arith.ori %13, %16 : vector<2x128xi1>
    %cst = arith.constant 0.000000e+00 : f32
    %18 = vector.broadcast %cst : f32 to vector<2x128xf32>
    %19 = arith.select %17, %0, %18 : vector<2x128xi1>, vector<2x128xf32>
    %20 = vector.shape_cast %19 : vector<2x128xf32> to vector<1x2x128xf32>
    %cst_3 = arith.constant dense<0.000000e+00> : vector<1xf32>
    %21 = vector.multi_reduction <add>, %20, %cst_3 [1, 2] : vector<1x2x128xf32> to vector<1xf32>
    %22 = vector.shape_cast %21 : vector<1xf32> to vector<1x1x1xf32>
    %23 = vector.extract %22[0, 0, 0] : f32 from vector<1x1x1xf32>
    %c0_4 = arith.constant 0 : index
    %c0_5 = arith.constant 0 : index
    %24 = memref.load %arg3[%c0_4, %c0_5] : memref<1x1xf32, #tpu.memory_space<smem>>
    memref.store %23, %arg3[%c0_4, %c0_5] : memref<1x1xf32, #tpu.memory_space<smem>>
    return
  }
  func.func @transform_0(%arg0: i32) -> (i32, i32) {
    %c0_i32 = arith.constant 0 : i32
    %c0_i32_0 = arith.constant 0 : i32
    return %arg0, %c0_i32 : i32, i32
  }
  func.func @transform_1(%arg0: i32) -> (i32, i32) {
    %c0_i32 = arith.constant 0 : i32
    %c0_i32_0 = arith.constant 0 : i32
    return %arg0, %c0_i32 : i32, i32
  }
  func.func @transform_2(%arg0: i32) -> (i32, i32) {
    %c0_i32 = arith.constant 0 : i32
    %c0_i32_0 = arith.constant 0 : i32
    return %arg0, %c0_i32 : i32, i32
  }
}

</mosaic_0001>

<bundles_post_ra>
// kernel: tpu_custom_call.1
= control target key start
LH: loop header
LB: loop body
LE: loop exit
PB: predicated region body
PF: predicated region fallthrough
CT: control target
= control target key end

     0   :  { %7 = vsyncpa [#allocation3], 0  ;;  %s187_s0 = inlined_call_operand.hbm [shape: f32[2,128], index: 0, kind: input, shape index: {}]   ;;  %s188_s1 = inlined_call_operand.hbm [shape: s32[2,4], index: 1, kind: input, shape index: {}]   ;;  %s189_s2 = inlined_call_operand.hbm [shape: f32[1,1], index: 2, kind: output, shape index: {}]  }
   0x1   :  { %8 = vsyncpa [#allocation6], 0 }
   0x2   :  { %9 = vsyncpa [#allocation4], 0  ;;  %s156_s9 = smov [#allocation2]   ;;  %s157_s11 = smov [#allocation5]  }
   0x3   :  { %s16_s10 = sshll.u32 %s156_s9, 4  ;;  %s26_s12 = sshll.u32 %s157_s11, 4  ;;  %s17_s10 = int_to_ptr.vmem [resolvable:$true] %s16_s10  ;;  %s27_s12 = int_to_ptr.vmem [resolvable:$true] %s26_s12 }
   0x4   :  { %s110_s13 = scalar_lea.vmem %s17_s10, 32  ;;  %p115_p1 = scmp.lt.s32.totalorder %s17_s10, %s17_s10 }
   0x5   :  { %p111_p0 = scmp.ne.s32.totalorder %s17_s10, %s110_s13  ;;  %p116_p2 = scmp.lt.s32.totalorder %s110_s13, %s110_s13 }
   0x7   :  { %p117_p3 = por %p116_p2, %p115_p1 }
   0x9   :  { %p118_p4 = pnand %p117_p3, %p111_p0 }
   0xb   :  { %121 = shalt.err (!%p118_p4)
}
   0xc   :  { %19 = dma.hbm_to_vmem [thread:$0]  %s187_s0, 32, %s17_s10, [#allocation3]  }
   0xd   :  { %s130_s16 = scalar_lea.vmem %s27_s12, 32  ;;  %p135_p6 = scmp.lt.s32.totalorder %s27_s12, %s27_s12 }
   0xe   :  { %p131_p5 = scmp.ne.s32.totalorder %s27_s12, %s130_s16  ;;  %p136_p7 = scmp.lt.s32.totalorder %s130_s16, %s130_s16 }
  0x10   :  { %p137_p8 = por %p136_p7, %p135_p6 }
  0x12   :  { %p138_p9 = pnand %p137_p8, %p131_p5 }
  0x14   :  { %141 = shalt.err (!%p138_p9)
}
  0x15   :  { %29 = dma.hbm_to_vmem [thread:$0]  %s188_s1, 32, %s27_s12, [#allocation6]  }
  0x16   :  { %150 = dma.done.wait [#allocation3], 32  }
  0x17   :  { %151 = vsyncadd [#allocation3], 4294967264 }
  0x18   :  { %152 = dma.done.wait [#allocation6], 32  }
  0x19   :  { %153 = vsyncadd [#allocation6], 4294967264  ;;  %v158_v0 = vmov 0   ;;  %v159_v1 = vmov 2   ;;  %v39_v2 = vld [vmem:[#allocation5] sm:$0x3]  ;;  %v37_v5 = vlaneseq }
  0x1a   :  { %97 = vset.pattern.permute.xlu0 %v158_v0  ;;  %99 = vset.pattern.permute.xlu1 %v159_v1  ;;  %v160_v3 = vmov 1   ;;  %v161_v4 = vmov 3   ;;  %v36_v11 = vld [vmem:[#allocation2] sm:$0x3]  ;;  %vm60_vm6 = vcmask 1041408   ;;  %s162_s1 = smov [#allocation7]  }
  0x1b   :  { %41 = vperm.xlu0 %97, %v39_v2   ;;  %50 = vperm.xlu1 %99, %v39_v2   ;;  %v38_v8 = vand.u32 127, %v37_v5 }
  0x1f   :  { %98 = vset.pattern.permute.xlu0 %v160_v3  ;;  %100 = vset.pattern.permute.xlu1 %v161_v4 }
  0x20   :  { %45 = vperm.xlu0 %98, %v39_v2   ;;  %55 = vperm.xlu1 %100, %v39_v2  }
  0x24   :  { %101 = vset.pattern.permute.xlu0 %v161_v4 }
  0x96   :  { %v42_v6 = vpop.permute.xlu0 %41  ;;  %v51_v7 = vpop.permute.xlu1 %50 }
  0x97   :  { %vm43_vm0 = vcmp.eq.s32.totalorder %v38_v8, %v42_v6  ;;  %vm52_vm3 = vcmp.eq.s32.totalorder %v38_v8, %v51_v7 }
  0x9b   :  { %v46_v9 = vpop.permute.xlu0 %45  ;;  %v56_v10 = vpop.permute.xlu1 %55 }
  0x9c   :  { %vm47_vm1 = vcmp.eq.s32.totalorder %v38_v8, %v46_v9  ;;  %vm57_vm2 = vcmp.eq.s32.totalorder %v38_v8, %v56_v10 }
  0x9d   :  { %vm48_vm4 = vmor %vm43_vm0, %vm47_vm1 }
  0x9e   :  { %vm53_vm5 = vmor %vm48_vm4, %vm52_vm3 }
  0x9f   :  { %vm58_vm7 = vmor %vm53_vm5, %vm57_vm2 }
  0xa0   :  { %v59_v12 = vsel %vm58_vm7, %v36_v11, 0.0 }
  0xa1   :  { %v61_v13 = vsel %vm60_vm6, %v59_v12, 0.0 }
  0xa2   :  { %62 = vadd.xlane.f32.xlu1 %v61_v13 }
 0x12b   :  { %v63_v14 = vpop.xlane.xlu1 %62 }
 0x12c   :  { %v64_v15 = vrot.slane %v63_v14, 4 }
 0x12e   :  { %v65_v16 = vadd.f32 %v64_v15, %v63_v14 }
 0x130   :  { %v66_v17 = vrot.slane %v65_v16, 2 }
 0x132   :  { %v67_v18 = vadd.f32 %v66_v17, %v65_v16 }
 0x134   :  { %v68_v19 = vrot.slane %v67_v18, 1 }
 0x136   :  { %v69_v20 = vadd.f32 %v68_v19, %v67_v18 }
 0x138   :  { %88 = vpush %v69_v20 }
 0x169   :  { %s89_s0 = spop %88 }
 0x16a   :  { %72 = sst [smem:[#allocation7]] %s89_s0 }
 0x16b   :  { %80 = dma.smem_to_hbm %s162_s1, 16, %s189_s2, [#allocation4]  }
 0x16c   :  { %154 = dma.done.wait [#allocation4], 16  }
 0x16d   :  { %155 = vsyncadd [#allocation4], 4294967280 }
 0x16e   :  { %84 = sfence }
 0x16f   :  { %85 = vsyncpa [#allocation3], 1 }
 0x170   :  { %86 = vsyncpa [#allocation6], 1 }
 0x171   :  { %87 = vsyncpa [#allocation4], 1 }

</bundles_post_ra>
